<compile_context>
chip_gen: v7x
topology: tpu7x:2x2x1
jax: 0.10.0
libtpu: 0.0.40
codegen_flags: <defaults>
</compile_context>

<pallas_src>
import functools

import jax
import jax.numpy as jnp
from jax.experimental import pallas as pl
from jax.experimental.pallas import tpu as pltpu


def _round_up(x, n):
    return (x + n - 1) // n * n


def _cdiv(a, b):
    return (a + b - 1) // b


def _onehot_kernel(x_ref, o_ref, *, m):
    # x_ref: (TB, THW)      -- packed input tile.
    # o_ref: (TB, m, THW)   -- one-hot output tile (lane-dense last dim).
    x = x_ref[...].astype(jnp.float32)
    # clamp first, then int cast: values are >= 0, so trunc == floor (matches
    # torch's .long() on the clamped value).
    idx = jnp.clip(x * float(m), 0.0, float(m - 1)).astype(jnp.int32)      # (TB, THW)
    # In-kernel sublane iota: VALU work hidden under the write roofline.
    k = jax.lax.broadcasted_iota(jnp.int32, (m, x.shape[1]), 0)            # (m, THW)
    o_ref[...] = (idx[:, None, :] == k[None, :, :]).astype(o_ref.dtype)


def onehot_pallas(x, m=32, *, out_dtype=jnp.float32, target_out_tile_bytes=8 << 20):
    """x: (B, C, H, W) -> (B, C*m, H, W) one-hot of floor(clamp(x*m, 0, m-1))."""
    b, c, h, w = x.shape
    bc, hw = b * c, h * w
    out_itemsize = jnp.dtype(out_dtype).itemsize
    x_itemsize = jnp.dtype(x.dtype).itemsize

    # ---- lane tile: multiple of 128 (or full hw), so >= 8 rows fit the budget ----
    max_lanes = max(128, (target_out_tile_bytes // (8 * m * out_itemsize)) // 128 * 128)
    if hw % 128 == 0:
        thw = min(hw, max_lanes)            # multiple of 128
    elif hw <= max_lanes:
        thw = hw                            # full-extent lane dim (legal block shape)
    else:
        thw = max_lanes                     # multiple of 128; Pallas masks the lane edge

    # ---- sublane tile: multiple of 8, budgeted ----
    row_out_bytes = m * thw * out_itemsize
    tb = max(8, (target_out_tile_bytes // row_out_bytes) // 8 * 8)
    tb = min(tb, _round_up(bc, 8))

    n_bc = _cdiv(bc, tb)
    n_hw = _cdiv(hw, thw)

    # ---- v7x: prefer an even total step count (2 TCs share the grid); split
    # the lane axis first so each TC's writebacks stay row-contiguous.
    if (n_bc * n_hw) % 2 == 1:
        if thw % 128 == 0 and thw >= 256:
            thw = _round_up((thw + 1) // 2, 128)
            n_hw = _cdiv(hw, thw)
        elif tb >= 16:
            tb = _round_up((tb + 1) // 2, 8)
            n_bc = _cdiv(bc, tb)

    # ---- VMEM budget (double-buffered in/out tiles + slack); explicit limit
    # avoids the 16 MiB default scoped-VMEM trap and stays <= 48 MiB for v7x.
    out_tile = tb * m * thw * out_itemsize
    in_tile = tb * thw * x_itemsize
    vmem_need = 2 * (out_tile + in_tile) + (4 << 20)
    vmem_limit = int(min(48 << 20, max(24 << 20, vmem_need)))

    cost = pl.CostEstimate(
        flops=bc * m * hw,
        transcendentals=0,
        bytes_accessed=bc * hw * x_itemsize + bc * m * hw * out_itemsize,
    )

    x_flat = x.reshape(bc, hw)              # contiguous reshape, no copy / no pad

    out_flat = pl.pallas_call(
        functools.partial(_onehot_kernel, m=m),
        out_shape=jax.ShapeDtypeStruct((bc, m, hw), out_dtype),   # exact shape: no crop
        grid_spec=pltpu.PrefetchScalarGridSpec(
            num_scalar_prefetch=0,
            grid=(n_bc, n_hw),
            in_specs=[
                pl.BlockSpec((tb, thw), lambda i, j: (i, j)),       # packed input tile
            ],
            out_specs=pl.BlockSpec((tb, m, thw), lambda i, j: (i, 0, j)),
        ),
        compiler_params=pltpu.CompilerParams(
            dimension_semantics=("parallel", "parallel"),
            vmem_limit_bytes=vmem_limit,
        ),
        cost_estimate=cost,
    )(x_flat)

    # (B*C, M, H*W) is already row-major-identical to (B, C*M, H, W).
    return out_flat.reshape(b, c * m, h, w)


def onehot_ref(x, m=32):
    """Pure-JAX reference mirroring the PyTorch forward exactly."""
    b, c, h, w = x.shape
    embedding = jnp.eye(m, dtype=jnp.float32)
    indices = jnp.clip(x * m, 0, m - 1).astype(jnp.int32)
    gathered = embedding[indices.reshape(-1)]                   # (B*C*H*W, M)
    return (gathered.reshape(b, c, h, w, m)
                    .transpose(0, 1, 4, 2, 3)
                    .reshape(b, -1, h, w))


if __name__ == "__main__":
    M = 32
    key = jax.random.PRNGKey(0)

    # Main case (matches the module's typical use): values in [0, 1).
    x = jax.random.uniform(key, (2, 4, 16, 16), dtype=jnp.float32)
    out = jax.block_until_ready(onehot_pallas(x, m=M))
    ref = onehot_ref(x, m=M)
    assert out.shape == (2, 4 * M, 16, 16), out.shape
    assert out.dtype == jnp.float32
    assert jnp.array_equal(out, ref), "mismatch vs reference (main)"

    # Non-divisible shape: exercises the no-pad / edge-masked path.
    x2 = jax.random.uniform(jax.random.PRNGKey(1), (2, 3, 5, 7), dtype=jnp.float32)
    out2 = jax.block_until_ready(onehot_pallas(x2, m=M))
    assert jnp.array_equal(out2, onehot_ref(x2, m=M)), "mismatch vs reference (ragged)"

    print("KERNEL_OK")
</pallas_src>

<mosaic_0001>
module attributes {stable_mosaic.version = 11 : i64} {
  func.func @_onehot_kernel(%arg0: i32, %arg1: i32, %arg2: memref<8x128xf32, #tpu.memory_space<vmem>>, %arg3: memref<8x32x128xf32, #tpu.memory_space<vmem>>) attributes {dimension_semantics = [#tpu.dimension_semantics<parallel>, #tpu.dimension_semantics<parallel>], iteration_bounds = array<i64: 1, 2>, scalar_prefetch = 0 : i64, scratch_operands = 0 : i64, tpu.core_type = #tpu.core_type<tc>, window_params = [{transform_indices = @transform_0, window_bounds = array<i64: 8, 128>}, {transform_indices = @transform_1, window_bounds = array<i64: 8, 32, 128>}]} {
    %c0 = arith.constant 0 : index
    %c0_0 = arith.constant 0 : index
    %0 = vector.load %arg2[%c0, %c0_0] : memref<8x128xf32, #tpu.memory_space<vmem>>, vector<8x128xf32>
    %cst = arith.constant 3.200000e+01 : f32
    %1 = vector.broadcast %cst : f32 to vector<8x128xf32>
    %2 = arith.mulf %0, %1 : vector<8x128xf32>
    %cst_1 = arith.constant 0.000000e+00 : f32
    %cst_2 = arith.constant 3.100000e+01 : f32
    %3 = vector.broadcast %cst_1 : f32 to vector<8x128xf32>
    %4 = arith.maximumf %3, %2 : vector<8x128xf32>
    %5 = vector.broadcast %cst_2 : f32 to vector<8x128xf32>
    %6 = arith.minimumf %5, %4 : vector<8x128xf32>
    %7 = arith.fptosi %6 : vector<8x128xf32> to vector<8x128xi32>
    %8 = tpu.iota {dimensions = array<i32: 0>} : vector<32x128xi32>
    %9 = vector.shape_cast %7 : vector<8x128xi32> to vector<8x1x128xi32>
    %10 = vector.shape_cast %8 : vector<32x128xi32> to vector<1x32x128xi32>
    %11 = vector.broadcast %9 : vector<8x1x128xi32> to vector<8x32x128xi32>
    %12 = vector.broadcast %10 : vector<1x32x128xi32> to vector<8x32x128xi32>
    %13 = arith.cmpi eq, %11, %12 : vector<8x32x128xi32>
    %14 = arith.extui %13 : vector<8x32x128xi1> to vector<8x32x128xi32>
    %15 = arith.sitofp %14 : vector<8x32x128xi32> to vector<8x32x128xf32>
    %c0_3 = arith.constant 0 : index
    %c0_4 = arith.constant 0 : index
    %c0_5 = arith.constant 0 : index
    %16 = vector.load %arg3[%c0_3, %c0_4, %c0_5] : memref<8x32x128xf32, #tpu.memory_space<vmem>>, vector<8x32x128xf32>
    tpu.vector_store %arg3[%c0_3, %c0_4, %c0_5], %15 {strides = array<i32>} : memref<8x32x128xf32, #tpu.memory_space<vmem>>, vector<8x32x128xf32>,
    return
  }
  func.func @transform_0(%arg0: i32, %arg1: i32) -> (i32, i32) {
    %c0_i32 = arith.constant 0 : i32
    return %arg0, %arg1 : i32, i32
  }
  func.func @transform_1(%arg0: i32, %arg1: i32) -> (i32, i32, i32) {
    %c0_i32 = arith.constant 0 : i32
    %c0_i32_0 = arith.constant 0 : i32
    return %arg0, %c0_i32, %arg1 : i32, i32, i32
  }
}

</mosaic_0001>

<bundles_post_ra>
// kernel: tpu_custom_call.1
= control target key start
LH: loop header
LB: loop body
LE: loop exit
PB: predicated region body
PF: predicated region fallthrough
CT: control target
= control target key end

     0   :  { %6 = vsyncpa [#allocation3], 0  ;;  %s1025_s0 = inlined_call_operand.hbm [shape: f32[8,256], index: 0, kind: input, shape index: {}]   ;;  %s1026_s1 = inlined_call_operand.hbm [shape: f32[8,32,256], index: 1, kind: output, shape index: {}]  }
   0x1   :  { %8 = vsyncpa [#allocation3 + $0x1], 0 }
   0x2   :  { %9 = vsyncpa [#allocation4], 0 }
   0x3   :  { %11 = vsyncpa [#allocation4 + $0x1], 0  ;;  %s716_s6 = smov 0   ;;  %s718_s7 = smov 0  }
   0x4   :  { %s720_s8 = smov 0   ;;  %s722_s9 = smov 0  }
   0x5   :  { %s724_s10 = smov 0   ;;  %s726_s11 = smov 0  }
   0x6 LB: > { %s471_s12 = sadd.s32 4294967295, %s697_s11   ;;  %s472_s13 = sadd.s32 4294967294, %s697_s11   ;;  %s697_s11 = sphi %s726_s11, %s17_s11   ;;  %s693_s10 = sphi %s724_s10, %s1042_s10   ;;  %s689_s9 = sphi %s722_s9, %s1041_s9   ;;  %s685_s8 = sphi %s720_s8, %s1040_s8   ;;  %s681_s7 = sphi %s718_s7, %s1039_s7   ;;  %s677_s6 = sphi %s716_s6, %s1038_s6  }
   0x7   : > { %s26_s14 = sadd.s32 1, %s693_s10  ;;  %s38_s15 = sadd.s32 1, %s685_s8 }
   0x8   : > { %p27_p0 = scmp.ge.s32.totalorder %s26_s14, 2  ;;  %p45_p1 = scmp.ne.s32.totalorder %s685_s8, %s681_s7 }
   0x9   : > { %p46_p2 = scmp.eq.s32.totalorder %s697_s11, 0  ;;  %p51_p3 = scmp.ne.s32.totalorder %s681_s7, %s677_s6 }
   0xa   : > { %s1044_s14 = smov (%p27_p0, %s26_s14), 0  ;;  %p52_p5 = scmp.eq.s32.totalorder %s471_s12, 0 }
   0xb   : > { %p757_p4 = por %p46_p2, %p45_p1  ;;  %s34_s17 = ssub.s32 %s693_s10, %s1044_s14 }
   0xc   : > { %p77_p6 = scmp.eq.s32.totalorder %s471_s12, 1  ;;  %p36_p7 = scmp.eq.s32.totalorder %s34_s17, 0 }
   0xd   : > { %p763_p8 = por %p52_p5, %p51_p3  ;;  %p83_p10 = scmp.eq.s32.totalorder %s472_s13, 1 }
   0xe   : > { %p767_p9 = por %p77_p6, %p45_p1  ;;  %p530_p13 = scmp.lt.s32.totalorder %s697_s11, 2 }
   0xf   : > { %s772_s20 = scalar_select %p36_p7, %s685_s8, %s38_s15  }
  0x10   : > { %s1030_s19 = scalar_select %p767_p9, 1, 0 }
  0x11   : > { %p774_p11 = por %p83_p10, %p51_p3  ;;  %s103_s22 = sand.u32 1, %s685_s8  }
  0x12   : > { %s475_s23 = sshll.u32 %s103_s22, 3  ;;  %s476_s24 = sshll.u32 %s693_s10, 7 }
  0x13   : > { %s1031_s21 = scalar_select %p774_p11, 1, 0 }
  0x14   : > { %s785_s27 = scalar_lea.hbm %s1025_s0, %s476_s24  ;;  %s107_s28 = scalar_lea.vmem [#allocation2], %s475_s23 }
  0x15   : > { %s116_s29 = sshll.u32 %s107_s28, 4  ;;  %p791_p0 = pnand %p530_p13, %p757_p4  ;;  %s787_s29 = int_to_ptr.vmem [resolvable:$true] %s116_s29 }
  0x16   : > { %s104_s2 = scalar_lea.sflag [#allocation3], %s103_s22  ;;  %s585_s3 = scalar_lea.hbm %s785_s27, 128 }
  0x17   : > { %p586_p3 = scmp.ne.s32.totalorder %s785_s27, %s585_s3  ;;  %p587_p5 = pneg %p791_p0 }
  0x18   : > { %s590_s12 = scalar_lea.hbm %s1025_s0, 256  ;;  %p591_p4 = scmp.lt.u32.totalorder %s785_s27, %s1025_s0 }
  0x19   : > { %p588_p6 = pnand %p587_p5, %p586_p3  ;;  %p592_p10 = scmp.lt.u32.totalorder %s590_s12, %s585_s3 }
  0x1a   : > { %p594_p12 = scmp.lt.u32.totalorder %s585_s3, %s785_s27 }
  0x1b   : > { %p589_p7 = pneg %p588_p6  ;;  %p593_p13 = por %p592_p10, %p591_p4 }
  0x1d   : > { %p595_p1 = por %p594_p12, %p593_p13 }
  0x1f   : > { %p596_p2 = pnand %p595_p1, %p589_p7 }
  0x21   : > { %599 = shalt.err (!%p596_p2)
}
  0x22   : > { %s600_s16 = scalar_lea.vmem %s787_s29, 128  ;;  %s699_s17 = smov [#allocation2]  }
  0x23   : > { %p601_p3 = scmp.ne.s32.totalorder %s787_s29, %s600_s16  ;;  %s605_s22 = sshll.u32 %s699_s17, 4  ;;  %s606_s22 = int_to_ptr.vmem [resolvable:$false] %s605_s22 }
  0x24   : > { %s607_s23 = scalar_lea.vmem %s606_s22, 256  ;;  %p608_p9 = scmp.lt.s32.totalorder %s787_s29, %s606_s22 }
  0x25   : > { %p603_p6 = pnand %p601_p3, %p587_p5  ;;  %p609_p4 = scmp.lt.s32.totalorder %s607_s23, %s600_s16 }
  0x27   : > { %p604_p11 = pneg %p603_p6  ;;  %p610_p10 = por %p609_p4, %p608_p9 }
  0x29   : > { %p611_p12 = pnand %p610_p10, %p604_p11 }
  0x2b   : > { %614 = shalt.err (!%p611_p12)
}
  0x2c   : > { %525 = dma.hbm_to_vmem [thread:$0]  (!%p791_p0), %s785_s27, 128, %s787_s29, %s104_s2  }
  0x2d   : > { %p1033_p1 = scmp.lt.s32.totalorder %s697_s11, 3  ;;  %p1034_p2 = scmp.ge.s32.totalorder %s697_s11, 1 }
  0x2f   : > { %p122_p5 = pnand %p1034_p2, %p1033_p1 }
  0x30   : > { %s827_s24 = sand.u32 (!%p122_p5), 1, %s681_s7  }
  0x31   : > { %125 = sbr.rel (%p122_p5) target bundleno = 113 (0x71), region = 24  ;;  %s478_s25 = sshll.u32 (!%p122_p5), %s827_s24, 3 }
  0x32   : > { %s128_s26 = scalar_lea.sflag (!%p122_p5), [#allocation3], %s827_s24  ;;  %s131_s28 = scalar_lea.vmem (!%p122_p5), [#allocation2], %s478_s25 }
  0x38   : > { %668 = dma.done.wait (%p763_p8), %s128_s26, 128  }
  0x39   : > { %670 = vsyncadd (%p763_p8), %s128_s26, 4294967168  ;;  %v156_v0 = vlaneseq  ;;  %v700_v1 = vmov 1966171168   ;;  %v151_v3 = vld [vmem:[%s131_s28] sm:$0xff]  ;;  %s479_s18 = sshll.u32 %s827_s24, 8  ;;  %v701_v26 = vmov 0.0  }
  0x3a   : > { %v163_v2 = vunpack.c.l.s4 %v700_v1  ;;  %v152_v4 = vmul.f32 32.0, %v151_v3  ;;  %s862_s27 = scalar_lea.vmem [#allocation5], %s479_s18  ;;  %s513_s29 = sshll.u32 %s689_s9, 7 }
  0x3b   : > { %v835_v6 = vshrl.u32 %v156_v0, 7  ;;  %s386_s30 = sshll.u32 %s862_s27, 4  ;;  %s962_s3 = scalar_lea.hbm %s1026_s1, %s513_s29  ;;  %s964_s30 = int_to_ptr.vmem [resolvable:$true] %s386_s30 }
  0x3c   : > { %v153_v5 = vmax.f32 %v152_v4, 0.0  ;;  %v164_v7 = vunpack.c.0.s8 %v163_v2  ;;  %s371_s4 = scalar_lea.sflag [#allocation4], %s827_s24  ;;  %s615_s5 = scalar_lea.vmem %s964_s30, 4096 }
  0x3d   : > { %v839_v13 = vsub.s32 0, %v835_v6  ;;  %v842_v15 = vadd.s32 8, %v835_v6  ;;  %v845_v16 = vadd.s32 16, %v835_v6  ;;  %v849_v18 = vadd.s32 24, %v835_v6  ;;  %p616_p8 = scmp.ne.s32.totalorder %s964_s30, %s615_s5  ;;  %p1035_p9 = scmp.ne.s32.totalorder %s1030_s19, 0 }
  0x3e   : > { %v154_v8 = vmin.f32 %v153_v5, 31.0  ;;  %v167_v10 = vsub.s32 %v164_v7, %v835_v6  ;;  %s702_s12 = smov [#allocation5]  }
  0x3f   : > { %p617_p11 = pnand %p616_p8, %p1035_p9  ;;  %s619_s13 = sshll.u32 %s702_s12, 4  ;;  %s620_s13 = int_to_ptr.vmem [resolvable:$false] %s619_s13 }
  0x40   : > { %v516_v9 = vtrunc.f32 %v154_v8  ;;  %s621_s15 = scalar_lea.vmem %s620_s13, 8192  ;;  %p622_p7 = scmp.lt.s32.totalorder %s964_s30, %s620_s13 }
  0x41   : > { %p618_p0 = pneg %p617_p11  ;;  %p623_p13 = scmp.lt.s32.totalorder %s621_s15, %s615_s5 }
  0x42   : > { %v517_v11 = vcvt.f32.s32 %v516_v9 }
  0x43   : > { %p624_p3 = por %p623_p13, %p622_p7 }
  0x44   : > { %v168_v12 = vrot.slane %v517_v11, %v167_v10  ;;  %v161_v14 = vcombine.high %v517_v11, %v517_v11 }
  0x45   : > { %p625_p6 = pnand %p624_p3, %p618_p0 }
  0x46   : > { %v184_v17 = vrot.slane %v168_v12, %v167_v10  ;;  %v176_v19 = vcombine.high %v168_v12, %v168_v12  ;;  %v175_v20 = vrot.slane %v161_v14, %v167_v10 }
  0x48   : > { %v213_v21 = vrot.slane %v184_v17, %v839_v13  ;;  %v206_v22 = vcombine.high %v184_v17, %v184_v17  ;;  %v198_v23 = vrot.slane %v176_v19, %v167_v10  ;;  %v852_v24 = vrot.slane %v175_v20, %v167_v10 }
  0x49   : > { %v177_v25 = vcombine.high %v175_v20, %v175_v20 }
  0x4a   : > { %vm242_vm0 = vcmp.eq.s32.totalorder %v213_v21, %v835_v6  ;;  %vm243_vm1 = vcmp.eq.s32.totalorder %v213_v21, %v842_v15  ;;  %vm244_vm2 = vcmp.eq.s32.totalorder %v213_v21, %v845_v16  ;;  %vm245_vm3 = vcmp.eq.s32.totalorder %v213_v21, %v849_v18 }
  0x4b   : > { %v480_v27 = vsel %vm242_vm0, 1.0, %v701_v26  ;;  %v481_v28 = vsel %vm243_vm1, 1.0, %v701_v26  ;;  %v482_v29 = vsel %vm244_vm2, 1.0, %v701_v26  ;;  %v483_v30 = vsel %vm245_vm3, 1.0, %v701_v26 }
  0x4c   : > { %338 = vst [vmem:[%s862_s27] sm:$0xff] %v480_v27  ;;  %339 = vst [vmem:[%s862_s27 + $0x8] sm:$0xff] %v481_v28  ;;  %v217_v31 = vrot.slane %v198_v23, %v839_v13  ;;  %v221_v32 = vrot.slane %v206_v22, %v839_v13  ;;  %v208_v33 = vcombine.high %v198_v23, %v198_v23 }
  0x4d   : > { %340 = vst [vmem:[%s862_s27 + $0x10] sm:$0xff] %v482_v29  ;;  %341 = vst [vmem:[%s862_s27 + $0x18] sm:$0xff] %v483_v30  ;;  %v229_v34 = vrot.slane %v852_v24, %v839_v13  ;;  %v872_v35 = vrot.slane %v177_v25, %v167_v10  ;;  %v207_v36 = vcombine.high %v852_v24, %v852_v24 }
  0x4e   : > { %vm246_vm4 = vcmp.eq.s32.totalorder %v217_v31, %v835_v6  ;;  %vm247_vm5 = vcmp.eq.s32.totalorder %v217_v31, %v842_v15  ;;  %vm248_vm6 = vcmp.eq.s32.totalorder %v217_v31, %v845_v16  ;;  %vm249_vm7 = vcmp.eq.s32.totalorder %v217_v31, %v849_v18 }
  0x4f   : > { %v484_v37 = vsel %vm246_vm4, 1.0, %v701_v26  ;;  %v485_v38 = vsel %vm247_vm5, 1.0, %v701_v26  ;;  %v486_v39 = vsel %vm248_vm6, 1.0, %v701_v26  ;;  %v487_v40 = vsel %vm249_vm7, 1.0, %v701_v26 }
  0x50   : > { %342 = vst [vmem:[%s862_s27 + $0x20] sm:$0xff] %v484_v37  ;;  %343 = vst [vmem:[%s862_s27 + $0x28] sm:$0xff] %v485_v38  ;;  %vm250_vm8 = vcmp.eq.s32.totalorder %v221_v32, %v835_v6  ;;  %vm251_vm9 = vcmp.eq.s32.totalorder %v221_v32, %v842_v15  ;;  %vm252_vm10 = vcmp.eq.s32.totalorder %v221_v32, %v845_v16 }
  0x51   : > { %344 = vst [vmem:[%s862_s27 + $0x30] sm:$0xff] %v486_v39  ;;  %345 = vst [vmem:[%s862_s27 + $0x38] sm:$0xff] %v487_v40  ;;  %vm253_vm11 = vcmp.eq.s32.totalorder %v221_v32, %v849_v18  ;;  %v488_v41 = vsel %vm250_vm8, 1.0, %v701_v26  ;;  %v489_v42 = vsel %vm251_vm9, 1.0, %v701_v26  ;;  %v490_v43 = vsel %vm252_vm10, 1.0, %v701_v26 }
  0x52   : > { %v491_v44 = vsel %vm253_vm11, 1.0, %v701_v26  ;;  %346 = vst [vmem:[%s862_s27 + $0x40] sm:$0xff] %v488_v41  ;;  %347 = vst [vmem:[%s862_s27 + $0x48] sm:$0xff] %v489_v42  ;;  %v225_v45 = vrot.slane %v208_v33, %v839_v13  ;;  %vm258_vm12 = vcmp.eq.s32.totalorder %v229_v34, %v835_v6  ;;  %vm259_vm13 = vcmp.eq.s32.totalorder %v229_v34, %v842_v15 }
  0x53   : > { %348 = vst [vmem:[%s862_s27 + $0x50] sm:$0xff] %v490_v43  ;;  %349 = vst [vmem:[%s862_s27 + $0x58] sm:$0xff] %v491_v44  ;;  %vm260_vm14 = vcmp.eq.s32.totalorder %v229_v34, %v845_v16  ;;  %v496_v46 = vsel %vm258_vm12, 1.0, %v701_v26  ;;  %v497_v47 = vsel %vm259_vm13, 1.0, %v701_v26  ;;  %vm261_vm15 = vcmp.eq.s32.totalorder %v229_v34, %v849_v18 }
  0x54   : > { %v498_v48 = vsel %vm260_vm14, 1.0, %v701_v26  ;;  %vm254_vm0 = vcmp.eq.s32.totalorder %v225_v45, %v835_v6  ;;  %vm255_vm1 = vcmp.eq.s32.totalorder %v225_v45, %v842_v15  ;;  %vm256_vm2 = vcmp.eq.s32.totalorder %v225_v45, %v845_v16  ;;  %354 = vst [vmem:[%s862_s27 + $0x80] sm:$0xff] %v496_v46  ;;  %355 = vst [vmem:[%s862_s27 + $0x88] sm:$0xff] %v497_v47 }
  0x55   : > { %vm257_vm3 = vcmp.eq.s32.totalorder %v225_v45, %v849_v18  ;;  %356 = vst [vmem:[%s862_s27 + $0x90] sm:$0xff] %v498_v48  ;;  %v492_v49 = vsel %vm254_vm0, 1.0, %v701_v26  ;;  %v493_v50 = vsel %vm255_vm1, 1.0, %v701_v26  ;;  %v494_v51 = vsel %vm256_vm2, 1.0, %v701_v26 }
  0x56   : > { %v495_v52 = vsel %vm257_vm3, 1.0, %v701_v26  ;;  %350 = vst [vmem:[%s862_s27 + $0x60] sm:$0xff] %v492_v49  ;;  %351 = vst [vmem:[%s862_s27 + $0x68] sm:$0xff] %v493_v50  ;;  %v499_v53 = vsel %vm261_vm15, 1.0, %v701_v26  ;;  %v233_v54 = vrot.slane %v872_v35, %v839_v13  ;;  %v237_v55 = vrot.slane %v207_v36, %v839_v13 }
  0x57   : > { %352 = vst [vmem:[%s862_s27 + $0x70] sm:$0xff] %v494_v51  ;;  %353 = vst [vmem:[%s862_s27 + $0x78] sm:$0xff] %v495_v52  ;;  %v209_v56 = vcombine.high %v872_v35, %v872_v35 }
  0x58   : > { %357 = vst [vmem:[%s862_s27 + $0x98] sm:$0xff] %v499_v53  ;;  %vm262_vm4 = vcmp.eq.s32.totalorder %v233_v54, %v835_v6  ;;  %vm263_vm5 = vcmp.eq.s32.totalorder %v233_v54, %v842_v15  ;;  %vm264_vm6 = vcmp.eq.s32.totalorder %v233_v54, %v845_v16  ;;  %vm265_vm7 = vcmp.eq.s32.totalorder %v233_v54, %v849_v18 }
  0x59   : > { %v500_v57 = vsel %vm262_vm4, 1.0, %v701_v26  ;;  %v501_v58 = vsel %vm263_vm5, 1.0, %v701_v26  ;;  %v502_v59 = vsel %vm264_vm6, 1.0, %v701_v26  ;;  %v503_v60 = vsel %vm265_vm7, 1.0, %v701_v26 }
  0x5a   : > { %358 = vst [vmem:[%s862_s27 + $0xa0] sm:$0xff] %v500_v57  ;;  %359 = vst [vmem:[%s862_s27 + $0xa8] sm:$0xff] %v501_v58  ;;  %vm266_vm8 = vcmp.eq.s32.totalorder %v237_v55, %v835_v6  ;;  %vm267_vm9 = vcmp.eq.s32.totalorder %v237_v55, %v842_v15  ;;  %vm268_vm10 = vcmp.eq.s32.totalorder %v237_v55, %v845_v16 }
  0x5b   : > { %360 = vst [vmem:[%s862_s27 + $0xb0] sm:$0xff] %v502_v59  ;;  %361 = vst [vmem:[%s862_s27 + $0xb8] sm:$0xff] %v503_v60  ;;  %vm269_vm11 = vcmp.eq.s32.totalorder %v237_v55, %v849_v18  ;;  %v504_v61 = vsel %vm266_vm8, 1.0, %v701_v26  ;;  %v505_v62 = vsel %vm267_vm9, 1.0, %v701_v26  ;;  %v506_v63 = vsel %vm268_vm10, 1.0, %v701_v26 }
  0x5c   : > { %v507_v0 = vsel %vm269_vm11, 1.0, %v701_v26  ;;  %362 = vst [vmem:[%s862_s27 + $0xc0] sm:$0xff] %v504_v61  ;;  %363 = vst [vmem:[%s862_s27 + $0xc8] sm:$0xff] %v505_v62  ;;  %v241_v1 = vrot.slane %v209_v56, %v839_v13 }
  0x5d   : > { %364 = vst [vmem:[%s862_s27 + $0xd0] sm:$0xff] %v506_v63  ;;  %365 = vst [vmem:[%s862_s27 + $0xd8] sm:$0xff] %v507_v0 }
  0x5e   : > { %vm270_vm12 = vcmp.eq.s32.totalorder %v241_v1, %v835_v6  ;;  %vm271_vm13 = vcmp.eq.s32.totalorder %v241_v1, %v842_v15  ;;  %vm272_vm14 = vcmp.eq.s32.totalorder %v241_v1, %v845_v16  ;;  %vm273_vm15 = vcmp.eq.s32.totalorder %v241_v1, %v849_v18 }
  0x5f   : > { %v508_v2 = vsel %vm270_vm12, 1.0, %v701_v26  ;;  %v509_v3 = vsel %vm271_vm13, 1.0, %v701_v26  ;;  %v510_v4 = vsel %vm272_vm14, 1.0, %v701_v26  ;;  %v511_v5 = vsel %vm273_vm15, 1.0, %v701_v26 }
  0x60   : > { %366 = vst [vmem:[%s862_s27 + $0xe0] sm:$0xff] %v508_v2  ;;  %367 = vst [vmem:[%s862_s27 + $0xe8] sm:$0xff] %v509_v3 }
  0x61   : > { %368 = vst [vmem:[%s862_s27 + $0xf0] sm:$0xff] %v510_v4  ;;  %369 = vst [vmem:[%s862_s27 + $0xf8] sm:$0xff] %v511_v5 }
  0x62   : > { %628 = shalt.err (!%p625_p6)
}
  0x63   : > { %s629_s16 = scalar_lea.hbm %s962_s3, 4096  ;;  %s633_s23 = scalar_lea.hbm %s1026_s1, 8192 }
  0x64   : > { %p630_p4 = scmp.ne.s32.totalorder %s962_s3, %s629_s16  ;;  %p634_p1 = scmp.lt.u32.totalorder %s962_s3, %s1026_s1 }
  0x65   : > { %p635_p2 = scmp.lt.u32.totalorder %s633_s23, %s629_s16  ;;  %p637_p8 = scmp.lt.u32.totalorder %s629_s16, %s962_s3 }
  0x66   : > { %p631_p10 = pnand %p630_p4, %p1035_p9 }
  0x67   : > { %p636_p5 = por %p635_p2, %p634_p1 }
  0x68   : > { %p632_p12 = pneg %p631_p10 }
  0x69   : > { %p638_p11 = por %p637_p8, %p636_p5 }
  0x6b   : > { %p639_p0 = pnand %p638_p11, %p632_p12 }
  0x6d   : > { %642 = shalt.err (!%p639_p0)
}
  0x6e   : > { %s703_s28 = smov 128   ;;  %s704_s18 = smov 256  }
  0x6f   : > { %s705_s27 = smov 8  }
  0x70   : > { %520 = dma.vmem_to_hbm [thread:$0]  (%p1035_p9), %s964_s30, 4096, %s962_s3, %s371_s4, %s703_s28, %s704_s18, %s705_s27  }
  0x71 PF: > { %s401_s29 = sand.u32 1, %s677_s6   ;;  %p1036_p7 = scmp.ne.s32.totalorder %s1031_s21, 0 }
  0x72   : > { %p1037_p13 = scmp.ge.s32.totalorder %s697_s11, 2  ;;  %s402_s9 = scalar_lea.sflag [#allocation4], %s401_s29 }
  0x74   : > { %p527_p3 = pnand %p1037_p13, %p1036_p7 }
  0x76   : > { %672 = dma.done.wait (!%p527_p3), %s402_s9, 4096  }
  0x77   : > { %674 = vsyncadd (!%p527_p3), %s402_s9, 4294963200  ;;  %s17_s11 = sadd.s32 1, %s697_s11   ;;  %s1038_s6 = smov %s681_s7 }
  0x78   : > { %p14_p6 = scmp.ge.s32.totalorder %s17_s11, 4   ;;  %s1039_s7 = smov %s685_s8 }
  0x79   : > { %s1040_s8 = smov %s772_s20  ;;  %s1041_s9 = smov %s693_s10 }
  0x7a   : > { %s1042_s10 = smov %s1044_s14  ;;  %16 = sbr.rel (!%p14_p6) target bundleno = 6 (0x6), region = 69 }
  0x81   :  { %407 = vsyncpa [#allocation3], 1 }
  0x82   :  { %409 = vsyncpa [#allocation3 + $0x1], 1 }
  0x83   :  { %410 = vsyncpa [#allocation4], 1 }
  0x84   :  { %412 = vsyncpa [#allocation4 + $0x1], 1 }

</bundles_post_ra>
